<compile_context>
chip_gen: v7x
topology: tpu7x:2x2x1
jax: 0.10.0
libtpu: 0.0.40
codegen_flags: <defaults>
</compile_context>

<pallas_src>
import functools
import math

import jax
import jax.numpy as jnp
import numpy as np
from jax.experimental import pallas as pl
from jax.experimental.pallas import tpu as pltpu


# -----------------------------------------------------------------------------
# Tile helper: largest divisor of `dim` that is <= target and `align`-aligned;
# falls back to the full extent (always a legal block size).
# -----------------------------------------------------------------------------
def _pick_tile(dim, target, align):
    if dim <= target:
        return dim
    t = min(target, dim)
    t -= t % align
    while t >= align:
        if dim % t == 0:
            return t
        t -= align
    return dim


# -----------------------------------------------------------------------------
# Kernel 1: tiled, pipelined linear   y = x @ W + b
#   x: (M,K), W: (K,N), b: (1,N)  ->  y: (M,N)
# -----------------------------------------------------------------------------
def _linear_kernel(x_ref, w_ref, b_ref, o_ref, acc_ref):
    @pl.when(pl.program_id(2) == 0)
    def _():
        acc_ref[...] = jnp.zeros_like(acc_ref)

    acc_ref[...] += jnp.dot(
        x_ref[...], w_ref[...], preferred_element_type=jnp.float32
    )

    @pl.when(pl.program_id(2) == pl.num_programs(2) - 1)
    def _():
        o_ref[...] = (acc_ref[...] + b_ref[...].astype(jnp.float32)).astype(
            o_ref.dtype
        )


def linear(x2d, w, b, *, tm=512, tn=512, tk=256):
    M, K = x2d.shape
    Kw, N = w.shape
    assert K == Kw and b.shape == (1, N)
    TM = _pick_tile(M, tm, 8)      # sublane axis: multiple of 8 (or full)
    TN = _pick_tile(N, tn, 128)    # lane axis:    multiple of 128 (or full)
    TK = _pick_tile(K, tk, 128)
    grid = (M // TM, N // TN, K // TK)
    return pl.pallas_call(
        _linear_kernel,
        out_shape=jax.ShapeDtypeStruct((M, N), x2d.dtype),
        grid=grid,
        in_specs=[
            pl.BlockSpec((TM, TK), lambda i, j, k: (i, k)),
            pl.BlockSpec((TK, TN), lambda i, j, k: (k, j)),
            pl.BlockSpec((1, TN), lambda i, j, k: (0, j)),
        ],
        out_specs=pl.BlockSpec((TM, TN), lambda i, j, k: (i, j)),
        scratch_shapes=[pltpu.VMEM((TM, TN), jnp.float32)],
        compiler_params=pltpu.CompilerParams(
            dimension_semantics=("parallel", "parallel", "arbitrary"),
            vmem_limit_bytes=32 * 1024 * 1024,
        ),
    )(x2d, w, b)


# -----------------------------------------------------------------------------
# Kernel 2: multi-head scaled-dot-product attention on the fused projection.
#   qkv block: (1, S, 2*H*d_k + H*d_v)  (all heads of one batch row)
#   outputs:   attn (H, 1, S, S)  and  out (1, S, H*d_v)  (merged layout)
# -----------------------------------------------------------------------------
def _mha_kernel(qkv_ref, attn_ref, out_ref, *, n_head, d_k, d_v, scale):
    qkv = qkv_ref[0]                       # (S, 2*H*d_k + H*d_v), f32
    inv_scale = 1.0 / scale
    k_off = n_head * d_k
    v_off = 2 * n_head * d_k

    outs = []
    for h in range(n_head):                # static, small: unrolled
        q = qkv[:, h * d_k:(h + 1) * d_k]                        # (S, d_k)
        k = qkv[:, k_off + h * d_k:k_off + (h + 1) * d_k]        # (S, d_k)
        v = qkv[:, v_off + h * d_v:v_off + (h + 1) * d_v]        # (S, d_v)

        # scores = q @ k^T  (2-D dot_general -> clean MXU lowering)
        u = jax.lax.dot_general(
            q, k, (((1,), (1,)), ((), ())),
            preferred_element_type=jnp.float32,
        ) * inv_scale
        # TODO(synk): optional boolean mask (masked_fill -inf) not wired in.
        m = jnp.max(u, axis=-1, keepdims=True)
        e = jnp.exp(u - m)
        denom = jnp.sum(e, axis=-1, keepdims=True)
        p = e * pl.reciprocal(denom, approx=False)               # f32 probs
        attn_ref[h, 0] = p.astype(attn_ref.dtype)

        outs.append(
            jnp.dot(p, v, preferred_element_type=jnp.float32)    # (S, d_v)
        )

    # single lane-dense store in the merged (S, H*d_v) layout
    out_ref[0] = jnp.concatenate(outs, axis=-1).astype(out_ref.dtype)


def multi_head_attention(qkv, batch, seq, n_head, d_k, d_v, scale):
    d_tot = qkv.shape[-1]
    qkv3 = qkv.reshape(batch, seq, d_tot)          # free reshape
    kernel = functools.partial(
        _mha_kernel, n_head=n_head, d_k=d_k, d_v=d_v, scale=scale
    )
    attn, out = pl.pallas_call(
        kernel,
        out_shape=(
            jax.ShapeDtypeStruct((n_head, batch, seq, seq), jnp.float32),
            jax.ShapeDtypeStruct((batch, seq, n_head * d_v), qkv.dtype),
        ),
        grid=(batch,),
        in_specs=[pl.BlockSpec((1, seq, d_tot), lambda b: (b, 0, 0))],
        out_specs=(
            pl.BlockSpec((n_head, 1, seq, seq), lambda b: (0, b, 0, 0)),
            pl.BlockSpec((1, seq, n_head * d_v), lambda b: (b, 0, 0)),
        ),
        compiler_params=pltpu.CompilerParams(
            dimension_semantics=("parallel",),
        ),
    )(qkv3)
    # (H, B, S, S) -> (H*B, S, S): free reshape, matches the PyTorch layout.
    return attn.reshape(n_head * batch, seq, seq), out


# -----------------------------------------------------------------------------
# Parameter construction (deterministic, mirrors module __init__ shapes).
# nn.Linear weights stored already transposed to (in, out).
# -----------------------------------------------------------------------------
def init_params(key, n_head, d_k, d_v, d_x, d_o, dtype=jnp.float32):
    def u(key, shape, fan):
        stdv = 1.0 / math.sqrt(fan)
        return jax.random.uniform(key, shape, dtype, minval=-stdv, maxval=stdv)

    ks = jax.random.split(key, 11)
    return {
        "wq": u(ks[0], (d_x, d_k), d_k),
        "wk": u(ks[1], (d_x, d_k), d_k),
        "wv": u(ks[2], (d_x, d_v), d_v),
        "fc_q_w": u(ks[3], (d_k, n_head * d_k), d_k),
        "fc_q_b": u(ks[4], (1, n_head * d_k), n_head * d_k),
        "fc_k_w": u(ks[5], (d_k, n_head * d_k), d_k),
        "fc_k_b": u(ks[6], (1, n_head * d_k), n_head * d_k),
        "fc_v_w": u(ks[7], (d_v, n_head * d_v), d_v),
        "fc_v_b": u(ks[8], (1, n_head * d_v), n_head * d_v),
        "fc_o_w": u(ks[9], (n_head * d_v, d_o), n_head * d_v),
        "fc_o_b": u(ks[10], (1, d_o), d_o),
    }


def fuse_params(params):
    """Algebraic fold of the back-to-back projections, done once:
       (x @ wq) @ fc_q_w + b  ==  x @ (wq @ fc_q_w) + b   (same for k, v),
       then q/k/v fused weights concatenated so one matmul produces QKV."""
    wq_f = params["wq"] @ params["fc_q_w"]        # (d_x, H*d_k)
    wk_f = params["wk"] @ params["fc_k_w"]        # (d_x, H*d_k)
    wv_f = params["wv"] @ params["fc_v_w"]        # (d_x, H*d_v)
    w_qkv = jnp.concatenate([wq_f, wk_f, wv_f], axis=1)
    b_qkv = jnp.concatenate(
        [params["fc_q_b"], params["fc_k_b"], params["fc_v_b"]], axis=1
    )
    return {
        "w_qkv": w_qkv,
        "b_qkv": b_qkv,
        "fc_o_w": params["fc_o_w"],
        "fc_o_b": params["fc_o_b"],
    }


# -----------------------------------------------------------------------------
# Full forward pass: 3 pallas_calls, zero activation transposes.
# -----------------------------------------------------------------------------
def selfattention_forward(fused, x, n_head, d_k, d_v, d_o):
    batch, seq, d_x = x.shape
    x2 = x.reshape(batch * seq, d_x)

    qkv = linear(x2, fused["w_qkv"], fused["b_qkv"])   # (B*S, 2H*dk + H*dv)

    scale = float(np.power(d_k, 0.5))
    attn, out = multi_head_attention(qkv, batch, seq, n_head, d_k, d_v, scale)

    y = linear(
        out.reshape(batch * seq, n_head * d_v), fused["fc_o_w"], fused["fc_o_b"]
    )
    return attn, y.reshape(batch, seq, d_o)


# -----------------------------------------------------------------------------
# Plain-JAX reference (faithful to the unfused PyTorch math).
# -----------------------------------------------------------------------------
def reference_forward(params, x, n_head, d_k, d_v, d_o):
    batch, S, _ = x.shape
    q = x @ params["wq"]
    k = x @ params["wk"]
    v = x @ params["wv"]
    q = q @ params["fc_q_w"] + params["fc_q_b"]
    k = k @ params["fc_k_w"] + params["fc_k_b"]
    v = v @ params["fc_v_w"] + params["fc_v_b"]

    def split_heads(t, d):
        t = t.reshape(batch, S, n_head, d)
        return jnp.transpose(t, (2, 0, 1, 3)).reshape(n_head * batch, S, d)

    qh, kh, vh = split_heads(q, d_k), split_heads(k, d_k), split_heads(v, d_v)
    u = jnp.einsum("bqd,bkd->bqk", qh, kh) / np.power(d_k, 0.5)
    attn = jax.nn.softmax(u, axis=2)
    out = jnp.einsum("bqk,bkd->bqd", attn, vh)
    out = out.reshape(n_head, batch, S, d_v)
    out = jnp.transpose(out, (1, 2, 0, 3)).reshape(batch, S, n_head * d_v)
    out = out @ params["fc_o_w"] + params["fc_o_b"]
    return attn, out


if __name__ == "__main__":
    n_head, d_k, d_v, d_x, d_o = 2, 16, 16, 16, 32
    batch, seq = 2, 8

    key = jax.random.PRNGKey(0)
    pkey, xkey = jax.random.split(key)
    params = init_params(pkey, n_head, d_k, d_v, d_x, d_o)
    fused = fuse_params(params)
    x = jax.random.normal(xkey, (batch, seq, d_x), dtype=jnp.float32)

    attn, out = selfattention_forward(fused, x, n_head, d_k, d_v, d_o)
    attn = jax.block_until_ready(attn)
    out = jax.block_until_ready(out)

    attn_ref, out_ref = reference_forward(params, x, n_head, d_k, d_v, d_o)
    assert attn.shape == (n_head * batch, seq, seq)
    assert out.shape == (batch, seq, d_o)
    np.testing.assert_allclose(
        np.asarray(attn), np.asarray(attn_ref), rtol=1e-4, atol=1e-5
    )
    np.testing.assert_allclose(
        np.asarray(out), np.asarray(out_ref), rtol=1e-4, atol=1e-5
    )

    print("KERNEL_OK")
</pallas_src>

<mosaic_0001>
module attributes {stable_mosaic.version = 11 : i64} {
  func.func @_linear_kernel(%arg0: i32, %arg1: i32, %arg2: i32, %arg3: memref<16x16xf32, #tpu.memory_space<vmem>>, %arg4: memref<16x96xf32, #tpu.memory_space<vmem>>, %arg5: memref<1x96xf32, #tpu.memory_space<vmem>>, %arg6: memref<16x96xf32, #tpu.memory_space<vmem>>, %arg7: memref<16x96xf32, #tpu.memory_space<vmem>>) attributes {dimension_semantics = [#tpu.dimension_semantics<parallel>, #tpu.dimension_semantics<parallel>, #tpu.dimension_semantics<arbitrary>], iteration_bounds = array<i64: 1, 1, 1>, scalar_prefetch = 0 : i64, scratch_operands = 1 : i64, tpu.core_type = #tpu.core_type<tc>, window_params = [{transform_indices = @transform_0, window_bounds = array<i64: 16, 16>}, {transform_indices = @transform_1, window_bounds = array<i64: 16, 96>}, {transform_indices = @transform_2, window_bounds = array<i64: 1, 96>}, {transform_indices = @transform_3, window_bounds = array<i64: 16, 96>}]} {
    %c0_i32 = arith.constant 0 : i32
    %0 = arith.cmpi eq, %arg2, %c0_i32 : i32
    %1 = arith.extui %0 : i1 to i32
    %c0_i32_0 = arith.constant 0 : i32
    %2 = arith.cmpi ne, %1, %c0_i32_0 : i32
    scf.if %2 {
      %cst_10 = arith.constant 0.000000e+00 : f32
      %12 = vector.broadcast %cst_10 : f32 to vector<16x96xf32>
      %c0_11 = arith.constant 0 : index
      %c0_12 = arith.constant 0 : index
      %13 = vector.load %arg7[%c0_11, %c0_12] : memref<16x96xf32, #tpu.memory_space<vmem>>, vector<16x96xf32>
      tpu.vector_store %arg7[%c0_11, %c0_12], %12 {strides = array<i32>} : memref<16x96xf32, #tpu.memory_space<vmem>>, vector<16x96xf32>,
    } else {
    }
    %c0 = arith.constant 0 : index
    %c0_1 = arith.constant 0 : index
    %3 = vector.load %arg7[%c0, %c0_1] : memref<16x96xf32, #tpu.memory_space<vmem>>, vector<16x96xf32>
    %c0_2 = arith.constant 0 : index
    %c0_3 = arith.constant 0 : index
    %4 = vector.load %arg3[%c0_2, %c0_3] : memref<16x16xf32, #tpu.memory_space<vmem>>, vector<16x16xf32>
    %c0_4 = arith.constant 0 : index
    %c0_5 = arith.constant 0 : index
    %5 = vector.load %arg4[%c0_4, %c0_5] : memref<16x96xf32, #tpu.memory_space<vmem>>, vector<16x96xf32>
    %cst = arith.constant dense<0.000000e+00> : vector<16x96xf32>
    %6 = tpu.matmul %4, %5, %cst {dimension_numbers = #tpu.dot_dimension_numbers<[1], [0], [0], [1], [0, 0, 1, 1], [], []>} : vector<16x16xf32>, vector<16x96xf32>, vector<16x96xf32> -> vector<16x96xf32>
    %7 = arith.addf %3, %6 : vector<16x96xf32>
    %c0_6 = arith.constant 0 : index
    %c0_7 = arith.constant 0 : index
    %8 = vector.load %arg7[%c0_6, %c0_7] : memref<16x96xf32, #tpu.memory_space<vmem>>, vector<16x96xf32>
    tpu.vector_store %arg7[%c0_6, %c0_7], %7 {strides = array<i32>} : memref<16x96xf32, #tpu.memory_space<vmem>>, vector<16x96xf32>,
    %c0_i32_8 = arith.constant 0 : i32
    %9 = arith.cmpi eq, %arg2, %c0_i32_8 : i32
    %10 = arith.extui %9 : i1 to i32
    %c0_i32_9 = arith.constant 0 : i32
    %11 = arith.cmpi ne, %10, %c0_i32_9 : i32
    scf.if %11 {
      %c0_10 = arith.constant 0 : index
      %c0_11 = arith.constant 0 : index
      %12 = vector.load %arg7[%c0_10, %c0_11] : memref<16x96xf32, #tpu.memory_space<vmem>>, vector<16x96xf32>
      %c0_12 = arith.constant 0 : index
      %c0_13 = arith.constant 0 : index
      %13 = vector.load %arg5[%c0_12, %c0_13] : memref<1x96xf32, #tpu.memory_space<vmem>>, vector<1x96xf32>
      %14 = vector.broadcast %13 : vector<1x96xf32> to vector<16x96xf32>
      %15 = arith.addf %12, %14 : vector<16x96xf32>
      %c0_14 = arith.constant 0 : index
      %c0_15 = arith.constant 0 : index
      %16 = vector.load %arg6[%c0_14, %c0_15] : memref<16x96xf32, #tpu.memory_space<vmem>>, vector<16x96xf32>
      tpu.vector_store %arg6[%c0_14, %c0_15], %15 {strides = array<i32>} : memref<16x96xf32, #tpu.memory_space<vmem>>, vector<16x96xf32>,
    } else {
    }
    return
  }
  func.func @transform_0(%arg0: i32, %arg1: i32, %arg2: i32) -> (i32, i32) {
    %c0_i32 = arith.constant 0 : i32
    return %arg0, %arg2 : i32, i32
  }
  func.func @transform_1(%arg0: i32, %arg1: i32, %arg2: i32) -> (i32, i32) {
    %c0_i32 = arith.constant 0 : i32
    return %arg2, %arg1 : i32, i32
  }
  func.func @transform_2(%arg0: i32, %arg1: i32, %arg2: i32) -> (i32, i32) {
    %c0_i32 = arith.constant 0 : i32
    %c0_i32_0 = arith.constant 0 : i32
    return %c0_i32, %arg1 : i32, i32
  }
  func.func @transform_3(%arg0: i32, %arg1: i32, %arg2: i32) -> (i32, i32) {
    %c0_i32 = arith.constant 0 : i32
    return %arg0, %arg1 : i32, i32
  }
}

</mosaic_0001>

<bundles_post_ra>
// kernel: tpu_custom_call.1
= control target key start
LH: loop header
LB: loop body
LE: loop exit
PB: predicated region body
PF: predicated region fallthrough
CT: control target
= control target key end

     0   :  { %8 = vsyncpa [#allocation4], 0  ;;  %s353_s0 = inlined_call_operand.hbm [shape: f32[16,16], index: 0, kind: input, shape index: {}]   ;;  %s354_s1 = inlined_call_operand.hbm [shape: f32[16,96], index: 1, kind: input, shape index: {}]   ;;  %s355_s2 = inlined_call_operand.vmem [shape: f32[1,96], index: 2, kind: input, shape index: {}]   ;;  %s356_s3 = inlined_call_operand.hbm [shape: f32[16,96], index: 3, kind: output, shape index: {}]  }
   0x1   :  { %9 = vsyncpa [#allocation7], 0 }
   0x2   :  { %10 = vsyncpa [#allocation5], 0  ;;  %s273_s12 = smov [#allocation3]   ;;  %s201_s16 = scalar_lea.hbm %s353_s0, 256 }
   0x3   :  { %s16_s13 = sshll.u32 %s273_s12, 4  ;;  %p202_p0 = scmp.ne.s32.totalorder %s353_s0, %s201_s16  ;;  %s17_s13 = int_to_ptr.vmem [resolvable:$true] %s16_s13 }
   0x4   :  { %p205_p1 = scmp.lt.u32.totalorder %s201_s16, %s353_s0 }
   0x6   :  { %p207_p2 = pnand %p205_p1, %p202_p0 }
   0x8   :  { %210 = shalt.err (!%p207_p2)
}
   0x9   :  { %s211_s21 = scalar_lea.vmem %s17_s13, 256  ;;  %p216_p4 = scmp.lt.s32.totalorder %s17_s13, %s17_s13 }
   0xa   :  { %p212_p3 = scmp.ne.s32.totalorder %s17_s13, %s211_s21  ;;  %p217_p5 = scmp.lt.s32.totalorder %s211_s21, %s211_s21 }
   0xc   :  { %p218_p6 = por %p217_p5, %p216_p4 }
   0xe   :  { %p219_p7 = pnand %p218_p6, %p212_p3 }
  0x10   :  { %222 = shalt.err (!%p219_p7)
}
  0x11   :  { %s274_s22 = smov 128   ;;  %s275_s23 = smov 8  }
  0x12   :  { %22 = dma.hbm_to_vmem [thread:$0]  %s353_s0, 256, %s17_s13, [#allocation4], %s274_s22, %s274_s22, %s275_s23  }
  0x13   :  { %s276_s26 = smov [#allocation6]   ;;  %s223_s30 = scalar_lea.hbm %s354_s1, 256 }
  0x14   :  { %s28_s27 = sshll.u32 %s276_s26, 4  ;;  %p224_p8 = scmp.ne.s32.totalorder %s354_s1, %s223_s30  ;;  %s29_s27 = int_to_ptr.vmem [resolvable:$true] %s28_s27 }
  0x15   :  { %p227_p9 = scmp.lt.u32.totalorder %s223_s30, %s354_s1 }
  0x17   :  { %p229_p10 = pnand %p227_p9, %p224_p8 }
  0x19   :  { %232 = shalt.err (!%p229_p10)
}
  0x1a   :  { %s233_s8 = scalar_lea.vmem %s29_s27, 256  ;;  %p238_p12 = scmp.lt.s32.totalorder %s29_s27, %s29_s27 }
  0x1b   :  { %p234_p11 = scmp.ne.s32.totalorder %s29_s27, %s233_s8  ;;  %p239_p13 = scmp.lt.s32.totalorder %s233_s8, %s233_s8 }
  0x1d   :  { %p240_p0 = por %p239_p13, %p238_p12 }
  0x1f   :  { %p241_p1 = pnand %p240_p0, %p234_p11 }
  0x21   :  { %244 = shalt.err (!%p241_p1)
}
  0x22   :  { %34 = dma.hbm_to_vmem [thread:$0]  %s354_s1, 256, %s29_s27, [#allocation7], %s274_s22, %s274_s22, %s275_s23  }
  0x23   :  { %267 = dma.done.wait [#allocation4], 256  }
  0x24   :  { %268 = vsyncadd [#allocation4], 4294967040 }
  0x25   :  { %269 = dma.done.wait [#allocation7], 256  }
  0x26   :  { %270 = vsyncadd [#allocation7], 4294967040  ;;  %vm47_vm0 = vcmask 785408   ;;  %v277_v0 = vmov 0.0   ;;  %vm56_vm1 = vcmask 130048   ;;  %v54_v1 = vld [vmem:[#allocation6] sm:$0xff] }
  0x27   :  { %49 = vst.msk [vmem:[#allocation2 + $0x8] sm:$0xff] %vm47_vm0, %v277_v0  ;;  %48 = vst.msk [vmem:[#allocation2] sm:$0xff] %vm47_vm0, %v277_v0  ;;  %v55_v2 = vld [vmem:[#allocation6 + $0x8] sm:$0xff]  ;;  %v52_v3 = vld [vmem:[#allocation3] sm:$0xff]  ;;  %s278_s11 = smov [#allocation8]  }
  0x28   :  { %v191_v4 = vpack.c.bf16 %v55_v2, %v54_v1  ;;  %188 = vmatprep.mubr.msk.f32.mxu0 %vm56_vm1, %v52_v3  ;;  %v53_v5 = vld [vmem:[#allocation3 + $0x8] sm:$0xff]  ;;  %v179_v12 = vld [vmem:[%s355_s2] ss:$0 sm:$0xff]  ;;  %s164_s12 = sshll.u32 %s278_s11, 4  ;;  %s165_s12 = int_to_ptr.vmem [resolvable:$true] %s164_s12 }
  0x29   :  { %s245_s13 = scalar_lea.vmem %s165_s12, 256  ;;  %p250_p3 = scmp.lt.s32.totalorder %s165_s12, %s165_s12 }
  0x2a   :  { %192 = vmatprep.subr.bf16.mxu0 %v191_v4  ;;  %p246_p2 = scmp.ne.s32.totalorder %s165_s12, %s245_s13  ;;  %p251_p4 = scmp.lt.s32.totalorder %s245_s13, %s245_s13 }
  0x2b   :  { %194 = vmatpush3.bf16.msra.mxu0 %v191_v4 }
  0x2c   :  { %p252_p5 = por %p251_p4, %p250_p3 }
  0x2e   :  { %189 = vmatmul.mubr.msk.f32.vlgmr.msra.gmra.mrb[0].mxu0 %vm56_vm1, %v53_v5  ;;  %v51_v6 = vld [vmem:[#allocation2 + $0x8] sm:$0xff]  ;;  %v50_v7 = vld [vmem:[#allocation2] sm:$0xff]  ;;  %p253_p6 = pnand %p252_p5, %p246_p2 }
 0x101   :  { %v190_v8 = vpop.f32.mrb[0].mxu0 }
 0x102   :  { %v139_v9 = vadd.f32 %v190_v8, %v51_v6  ;;  %v129_v10 = vpop.f32.mrb[1].mxu0 }
 0x103   :  { %v138_v11 = vadd.f32 %v129_v10, %v50_v7 }
 0x104   :  { %142 = vst.msk [vmem:[#allocation2 + $0x8] sm:$0xff] %vm47_vm0, %v139_v9 }
 0x105   :  { %141 = vst.msk [vmem:[#allocation2] sm:$0xff] %vm47_vm0, %v138_v11 }
 0x10b   :  { %v147_v13 = vld [vmem:[#allocation2 + $0x8] sm:$0xff] }
 0x10c   :  { %v146_v14 = vld [vmem:[#allocation2] sm:$0xff]  ;;  %v156_v15 = vadd.f32 %v179_v12, %v147_v13 }
 0x10d   :  { %v155_v16 = vadd.f32 %v179_v12, %v146_v14 }
 0x10e   :  { %158 = vst.msk [vmem:[#allocation8 + $0x8] sm:$0xff] %vm47_vm0, %v156_v15 }
 0x10f   :  { %157 = vst.msk [vmem:[#allocation8] sm:$0xff] %vm47_vm0, %v155_v16 }
 0x110   :  { %256 = shalt.err (!%p253_p6)
}
 0x111   :  { %s257_s15 = scalar_lea.hbm %s356_s3, 256 }
 0x112   :  { %p258_p7 = scmp.ne.s32.totalorder %s356_s3, %s257_s15  ;;  %p261_p8 = scmp.lt.u32.totalorder %s257_s15, %s356_s3 }
 0x114   :  { %p263_p9 = pnand %p261_p8, %p258_p7 }
 0x116   :  { %266 = shalt.err (!%p263_p9)
}
 0x117   :  { %170 = dma.vmem_to_hbm [thread:$0]  %s165_s12, 256, %s356_s3, [#allocation5], %s274_s22, %s274_s22, %s275_s23  }
 0x118   :  { %271 = dma.done.wait [#allocation5], 256  }
 0x119   :  { %272 = vsyncadd [#allocation5], 4294967040 }
 0x11a   :  { %174 = vsyncpa [#allocation4], 1 }
 0x11b   :  { %175 = vsyncpa [#allocation7], 1 }
 0x11c   :  { %176 = vsyncpa [#allocation5], 1 }

</bundles_post_ra>
